<compile_context>
chip_gen: v7x
topology: tpu7x:2x2x1
jax: 0.10.0
libtpu: 0.0.40
codegen_flags: <defaults>
</compile_context>

<pallas_src>
import functools

import jax
import jax.numpy as jnp
from jax.experimental import pallas as pl
from jax.experimental.pallas import tpu as pltpu


def _channel_pad_amounts(c_in: int, channels: int, where: str):
    """(pad_before, pad_after) along channels, replicating pad_to_shape +
    list(reversed(padding)) + F.pad exactly."""
    diff = channels - c_in
    if diff <= 0:
        return 0, 0
    if diff % 2 == 0:
        if where == 'center':
            a, b = diff // 2, diff // 2
        elif where == 'start':
            a, b = 0, diff
        elif where == 'end':
            a, b = diff, 0
        else:
            raise ValueError(f'Invalid where: {where}')
    elif diff == 1:
        if where in ('center', 'end'):
            a, b = 1, 0
        elif where == 'start':
            a, b = 0, 1
        else:
            raise ValueError(f'Invalid where: {where}')
    else:
        if where == 'center':
            a, b = diff // 2, diff // 2 + 1
        elif where == 'start':
            a, b = 0, diff
        elif where == 'end':
            a, b = diff, 0
        else:
            raise ValueError(f'Invalid where: {where}')
    # list(reversed(padding)) swaps (left, right) within each pair before F.pad,
    # so "extend([a, b])" becomes pad_before=b, pad_after=a.
    return b, a


def _pad_kernel(x_ref, o_ref, *, pad_before: int, pad_after: int,
                c_in: int, value):
    bt, _, thw = o_ref.shape          # static block dims
    dt = o_ref.dtype
    # Only the pad regions are filled; the data region is stored exactly once.
    # TODO(synk): a single full-tile store built via an unaligned sublane
    # concatenate would avoid masked vst when pad_before isn't a multiple of
    # the sublane tile; kept as separate stores since at MiB-scale blocks the
    # store work is fully hidden under the output DMA.
    if pad_before > 0:
        o_ref[:, :pad_before, :] = jnp.full((bt, pad_before, thw), value, dt)
    if pad_after > 0:
        o_ref[:, pad_before + c_in:, :] = jnp.full((bt, pad_after, thw), value, dt)
    o_ref[:, pad_before:pad_before + c_in, :] = x_ref[...]


def _tpu_params():
    """Best-effort (physical VMEM bytes per TensorCore, TensorCores per chip)."""
    vmem_bytes = 128 * 1024 * 1024
    num_tc = 1
    try:
        info = pltpu.get_tpu_info()
        v = getattr(info, 'vmem_capacity_bytes', None)
        if isinstance(v, (int, float)) and v > 0:
            vmem_bytes = int(v)
        for attr in ('num_tensorcores', 'tensorcores_per_chip',
                     'num_tensor_cores', 'num_cores', 'core_count'):
            c = getattr(info, attr, None)
            if isinstance(c, (int, float)) and c > 0:
                num_tc = max(1, min(8, int(c)))
                break
    except Exception:
        pass
    return vmem_bytes, num_tc


def _choose_tiles(n, c_in, channels, hw, dtype_bytes, vmem_budget_bytes, num_tc):
    """Pick (B_TILE, TILE_HW, num_hw_tiles).

    Double-buffered in+out blocks (with sublane-padded channel counts) fit the
    VMEM budget, the lane axis stays 128-aligned (or the full dim), and small
    images group batch elements (byte-based ~4 MiB output-block cap) to
    amortize the ~0.35us/step grid overhead."""
    # Sublane-padded channel counts: 8 rows f32/i32, 16 bf16, 32 int8.
    sub = max(8, 32 // max(1, dtype_bytes))
    c_in_p = pl.cdiv(c_in, sub) * sub
    channels_p = pl.cdiv(channels, sub) * sub
    # Double-buffered input + output bytes per lane, per batch row.
    per_lane = 2 * (c_in_p + channels_p) * dtype_bytes

    # HW tile: full dim if it fits the budget, else the largest 128-aligned
    # width that does (no artificial lane cap -> MiB-scale blocks).
    max_lanes = max(128, vmem_budget_bytes // per_lane)
    if hw <= max_lanes:
        tile_hw = hw                                     # full dim: always legal
    else:
        tile_hw = max(128, (max_lanes // 128) * 128)
    num_hw_tiles = pl.cdiv(hw, tile_hw)

    tiny = n * channels_p * hw * dtype_bytes < (1 << 20)

    # Batch grouping: byte caps only (no divisibility requirement — the cdiv
    # grid masks ragged edge blocks).
    out_block_cap = 4 << 20
    max_b_out = max(1, out_block_cap // (channels_p * tile_hw * dtype_bytes))
    max_b_vmem = max(1, vmem_budget_bytes // (per_lane * tile_hw))
    b_tile = min(n, max_b_out, max_b_vmem)

    # Megacore gate: only on multi-TC chips (v7x), keep >= num_tc grid steps
    # so no TensorCore idles; v5e/v6e have one TC so nothing to gate.
    if num_tc > 1 and not tiny:
        if num_hw_tiles < num_tc:
            b_tile = min(b_tile, max(1, pl.cdiv(n, num_tc)))
        if pl.cdiv(n, b_tile) * num_hw_tiles < num_tc and hw >= 128 * num_tc:
            tile_hw = max(128, pl.cdiv(pl.cdiv(hw, num_tc), 128) * 128)
            num_hw_tiles = pl.cdiv(hw, tile_hw)

    return b_tile, tile_hw, num_hw_tiles


def pad_to_channels_pallas(x, channels: int, where: str = 'center',
                           mode: str = 'constant', value=None, *,
                           vmem_budget_bytes=None,
                           xla_fallback_bytes: int = 0):
    """x: (N, C_in, H, W) -> (N, channels, H, W), constant-padded along C."""
    if mode != 'constant':
        # TODO(synk): reflect/replicate/circular along the channel dim is not
        # supported by F.pad for 4-D inputs either; only 'constant' here.
        raise NotImplementedError("only mode='constant' is implemented")

    n, c_in, h, w = x.shape
    # Matches PyTorch: equal shape -> early return; channels < c_in -> F.pad is
    # called with all-zero padding and the input comes back unchanged.
    if channels <= c_in:
        return x

    pad_before, pad_after = _channel_pad_amounts(c_in, channels, where)
    pad_value = 0 if value is None else value     # keep dtype fidelity (no float())
    hw = h * w
    dtype_bytes = jnp.dtype(x.dtype).itemsize

    vmem_phys, num_tc = _tpu_params()
    if vmem_budget_bytes is None:
        # ~48 MiB on 128-MiB-VMEM parts (v5e/v6e), ~24 MiB on 64-MiB (v7x):
        # double-buffered in+out block footprint target.
        vmem_budget_bytes = max(8 << 20, min(48 << 20, vmem_phys * 3 // 8))

    # Optional XLA fallback for tiny tensors where pallas_call fixed overhead
    # dominates (disabled by default so the Pallas path is always exercised).
    if n * channels * hw * dtype_bytes < xla_fallback_bytes:
        return jnp.pad(x, ((0, 0), (pad_before, pad_after), (0, 0), (0, 0)),
                       mode='constant', constant_values=pad_value)

    b_tile, tile_hw, num_hw_tiles = _choose_tiles(
        n, c_in, channels, hw, dtype_bytes, vmem_budget_bytes, num_tc)

    # Scoped-VMEM limit matching the budget (plus headroom), capped below the
    # physical capacity so larger tiles aren't rejected by the default limit.
    vmem_limit = int(min(vmem_phys * 7 // 8, vmem_budget_bytes + (16 << 20)))

    x_flat = x.reshape(n, c_in, hw)
    kernel = functools.partial(_pad_kernel, pad_before=pad_before,
                               pad_after=pad_after, c_in=c_in, value=pad_value)

    # TODO(synk): a structural variant could route the bulk data region as a
    # single strided HBM->HBM DMA and only fill the pad channels from the
    # grid; kept on the pipelined path for simplicity/robustness.
    out_flat = pl.pallas_call(
        kernel,
        out_shape=jax.ShapeDtypeStruct((n, channels, hw), x.dtype),
        grid_spec=pltpu.PrefetchScalarGridSpec(
            num_scalar_prefetch=0,
            grid=(pl.cdiv(n, b_tile), num_hw_tiles),
            in_specs=[pl.BlockSpec((b_tile, c_in, tile_hw),
                                   lambda b, t: (b, 0, t))],
            out_specs=pl.BlockSpec((b_tile, channels, tile_hw),
                                   lambda b, t: (b, 0, t)),
        ),
        compiler_params=pltpu.CompilerParams(
            dimension_semantics=("parallel", "parallel"),
            vmem_limit_bytes=vmem_limit),
    )(x_flat)

    return out_flat.reshape(n, channels, h, w)


class PadToChannels:
    """JAX/Pallas equivalent of the PyTorch PadToChannels module."""

    def __init__(self, channels, where='center', mode='constant', value=None):
        self.channels = channels
        self.where = where
        self.mode = mode
        self.value = value

    def __call__(self, x):
        return pad_to_channels_pallas(x, self.channels, where=self.where,
                                      mode=self.mode, value=self.value)


def _reference(x, channels, where='center', value=None):
    """Pure-JAX reference reproducing the PyTorch semantics (for validation)."""
    n, c_in, h, w = x.shape
    if channels <= c_in:
        return x
    pb, pa = _channel_pad_amounts(c_in, channels, where)
    cv = 0 if value is None else value
    return jnp.pad(x, ((0, 0), (pb, pa), (0, 0), (0, 0)),
                   mode='constant', constant_values=cv)


if __name__ == "__main__":
    key = jax.random.PRNGKey(0)
    x = jax.random.normal(key, (2, 4, 16, 16), dtype=jnp.float32)

    ok = True
    # f32: even diff, odd diff > 1, diff == 1, no-op, channels < c_in.
    for where in ('center', 'start', 'end'):
        for channels in (8, 7, 5, 4, 3):
            out = jax.block_until_ready(PadToChannels(channels, where=where)(x))
            ref = _reference(x, channels, where=where)
            if out.shape != ref.shape or not jnp.allclose(out, ref):
                ok = False

    # bf16 input (packed dtype path).
    x_bf16 = x.astype(jnp.bfloat16)
    out = jax.block_until_ready(PadToChannels(9, where='center')(x_bf16))
    ref = _reference(x_bf16, 9, where='center')
    if out.shape != ref.shape or not jnp.array_equal(out, ref):
        ok = False

    # int32 input with nonzero pad value (dtype-faithful constant).
    x_i32 = jax.random.randint(key, (2, 4, 16, 16), -5, 5, dtype=jnp.int32)
    out = jax.block_until_ready(PadToChannels(8, where='end', value=3)(x_i32))
    ref = _reference(x_i32, 8, where='end', value=3)
    if out.shape != ref.shape or not jnp.array_equal(out, ref):
        ok = False

    # Force the tiled-HW code path (128-lane tiles, partial last lane tile) by
    # shrinking the VMEM budget; spatial 16x18 -> hw=288 (not a multiple of 128).
    x_odd = jax.random.normal(key, (2, 4, 16, 18), dtype=jnp.float32)
    out = jax.block_until_ready(
        pad_to_channels_pallas(x_odd, 8, where='center',
                               vmem_budget_bytes=16 * 1024))
    ref = _reference(x_odd, 8, where='center')
    if out.shape != ref.shape or not jnp.allclose(out, ref):
        ok = False

    # Ragged batch grouping (n=3, b_tile=2 -> partial last batch block).
    x3 = jax.random.normal(key, (3, 4, 16, 16), dtype=jnp.float32)
    out = jax.block_until_ready(
        pad_to_channels_pallas(x3, 8, where='center',
                               vmem_budget_bytes=64 * 1024))
    ref = _reference(x3, 8, where='center')
    if out.shape != ref.shape or not jnp.allclose(out, ref):
        ok = False

    if ok:
        print("KERNEL_OK")
</pallas_src>

<mosaic_0001>
module attributes {stable_mosaic.version = 11 : i64} {
  func.func @_pad_kernel(%arg0: i32, %arg1: i32, %arg2: memref<2x4x256xf32, #tpu.memory_space<vmem>>, %arg3: memref<2x8x256xf32, #tpu.memory_space<vmem>>) attributes {dimension_semantics = [#tpu.dimension_semantics<parallel>, #tpu.dimension_semantics<parallel>], iteration_bounds = array<i64: 1, 1>, scalar_prefetch = 0 : i64, scratch_operands = 0 : i64, tpu.core_type = #tpu.core_type<tc>, window_params = [{transform_indices = @transform_0, window_bounds = array<i64: 2, 4, 256>}, {transform_indices = @transform_1, window_bounds = array<i64: 2, 8, 256>}]} {
    %cst = arith.constant 0.000000e+00 : f32
    %0 = vector.broadcast %cst : f32 to vector<2x2x256xf32>
    %c0 = arith.constant 0 : index
    %c0_0 = arith.constant 0 : index
    %c0_1 = arith.constant 0 : index
    %1 = vector.load %arg3[%c0, %c0_0, %c0_1] : memref<2x8x256xf32, #tpu.memory_space<vmem>>, vector<2x2x256xf32>
    tpu.vector_store %arg3[%c0, %c0_0, %c0_1], %0 {strides = array<i32>} : memref<2x8x256xf32, #tpu.memory_space<vmem>>, vector<2x2x256xf32>,
    %cst_2 = arith.constant 0.000000e+00 : f32
    %2 = vector.broadcast %cst_2 : f32 to vector<2x2x256xf32>
    %c0_3 = arith.constant 0 : index
    %c6 = arith.constant 6 : index
    %c0_4 = arith.constant 0 : index
    %3 = vector.load %arg3[%c0_3, %c6, %c0_4] : memref<2x8x256xf32, #tpu.memory_space<vmem>>, vector<2x2x256xf32>
    tpu.vector_store %arg3[%c0_3, %c6, %c0_4], %2 {strides = array<i32>} : memref<2x8x256xf32, #tpu.memory_space<vmem>>, vector<2x2x256xf32>,
    %c0_5 = arith.constant 0 : index
    %c0_6 = arith.constant 0 : index
    %c0_7 = arith.constant 0 : index
    %4 = vector.load %arg2[%c0_5, %c0_6, %c0_7] : memref<2x4x256xf32, #tpu.memory_space<vmem>>, vector<2x4x256xf32>
    %c0_8 = arith.constant 0 : index
    %c2 = arith.constant 2 : index
    %c0_9 = arith.constant 0 : index
    %5 = vector.load %arg3[%c0_8, %c2, %c0_9] : memref<2x8x256xf32, #tpu.memory_space<vmem>>, vector<2x4x256xf32>
    tpu.vector_store %arg3[%c0_8, %c2, %c0_9], %4 {strides = array<i32>} : memref<2x8x256xf32, #tpu.memory_space<vmem>>, vector<2x4x256xf32>,
    return
  }
  func.func @transform_0(%arg0: i32, %arg1: i32) -> (i32, i32, i32) {
    %c0_i32 = arith.constant 0 : i32
    %c0_i32_0 = arith.constant 0 : i32
    return %arg0, %c0_i32, %arg1 : i32, i32, i32
  }
  func.func @transform_1(%arg0: i32, %arg1: i32) -> (i32, i32, i32) {
    %c0_i32 = arith.constant 0 : i32
    %c0_i32_0 = arith.constant 0 : i32
    return %arg0, %c0_i32, %arg1 : i32, i32, i32
  }
}

</mosaic_0001>

<bundles_post_ra>
// kernel: tpu_custom_call.1
= control target key start
LH: loop header
LB: loop body
LE: loop exit
PB: predicated region body
PF: predicated region fallthrough
CT: control target
= control target key end

     0   :  { %6 = vsyncpa [#allocation3], 0  ;;  %s164_s0 = inlined_call_operand.hbm [shape: f32[2,4,256], index: 0, kind: input, shape index: {}]   ;;  %s165_s1 = inlined_call_operand.hbm [shape: f32[2,8,256], index: 1, kind: output, shape index: {}]  }
   0x1   :  { %7 = vsyncpa [#allocation4], 0  ;;  %s123_s6 = smov [#allocation2]   ;;  %s75_s10 = scalar_lea.hbm %s164_s0, 256 }
   0x2   :  { %s13_s7 = sshll.u32 %s123_s6, 4  ;;  %p76_p0 = scmp.ne.s32.totalorder %s164_s0, %s75_s10  ;;  %s14_s7 = int_to_ptr.vmem [resolvable:$true] %s13_s7 }
   0x3   :  { %p79_p1 = scmp.lt.u32.totalorder %s75_s10, %s164_s0 }
   0x5   :  { %p81_p2 = pnand %p79_p1, %p76_p0 }
   0x7   :  { %84 = shalt.err (!%p81_p2)
}
   0x8   :  { %s85_s15 = scalar_lea.vmem %s14_s7, 256  ;;  %p90_p4 = scmp.lt.s32.totalorder %s14_s7, %s14_s7 }
   0x9   :  { %p86_p3 = scmp.ne.s32.totalorder %s14_s7, %s85_s15  ;;  %p91_p5 = scmp.lt.s32.totalorder %s85_s15, %s85_s15 }
   0xb   :  { %p92_p6 = por %p91_p5, %p90_p4 }
   0xd   :  { %p93_p7 = pnand %p92_p6, %p86_p3 }
   0xf   :  { %96 = shalt.err (!%p93_p7)
}
  0x10   :  { %s124_s16 = smov 128   ;;  %s125_s17 = smov 8  }
  0x11   :  { %19 = dma.hbm_to_vmem [thread:$0]  %s164_s0, 256, %s14_s7, [#allocation3], %s124_s16, %s124_s16, %s125_s17  }
  0x12   :  { %119 = dma.done.wait [#allocation3], 256  }
  0x13   :  { %120 = vsyncadd [#allocation3], 4294967040  ;;  %v126_v0 = vmov 0.0   ;;  %v31_v1 = vld [vmem:[#allocation2] sm:$0xff]  ;;  %v32_v2 = vld [vmem:[#allocation2 + $0x8] sm:$0xff]  ;;  %s127_s20 = smov [#allocation5]  }
  0x14   :  { %23 = vst [vmem:[#allocation5] sm:$0x3] %v126_v0  ;;  %24 = vst [vmem:[#allocation5 + $0x8] sm:$0x3] %v126_v0  ;;  %s54_s21 = sshll.u32 %s127_s20, 4  ;;  %v37_v3 = vrot.slane %v31_v1, 6  ;;  %v35_v4 = vcombine.high %v31_v1, %v31_v1  ;;  %v36_v6 = vcombine.high %v32_v2, %v32_v2  ;;  %s55_s21 = int_to_ptr.vmem [resolvable:$true] %s54_s21 }
  0x15   :  { %25 = vst [vmem:[#allocation5 + $0x10] sm:$0x3] %v126_v0  ;;  %26 = vst [vmem:[#allocation5 + $0x18] sm:$0x3] %v126_v0  ;;  %v39_v5 = vrot.slane %v32_v2, 6  ;;  %s97_s0 = scalar_lea.vmem %s55_s21, 512  ;;  %p102_p9 = scmp.lt.s32.totalorder %s55_s21, %s55_s21 }
  0x16   :  { %27 = vst [vmem:[#allocation5] sm:$0xc0] %v126_v0  ;;  %28 = vst [vmem:[#allocation5 + $0x8] sm:$0xc0] %v126_v0  ;;  %v38_v7 = vrot.slane %v35_v4, 6  ;;  %v40_v8 = vrot.slane %v36_v6, 6  ;;  %p98_p8 = scmp.ne.s32.totalorder %s55_s21, %s97_s0  ;;  %p103_p10 = scmp.lt.s32.totalorder %s97_s0, %s97_s0 }
  0x17   :  { %29 = vst [vmem:[#allocation5 + $0x10] sm:$0xc0] %v126_v0  ;;  %30 = vst [vmem:[#allocation5 + $0x18] sm:$0xc0] %v126_v0 }
  0x18   :  { %45 = vst [vmem:[#allocation5] sm:$0x3c] %v37_v3  ;;  %47 = vst [vmem:[#allocation5 + $0x10] sm:$0x3c] %v39_v5  ;;  %p104_p11 = por %p103_p10, %p102_p9 }
  0x19   :  { %46 = vst [vmem:[#allocation5 + $0x8] sm:$0x3c] %v38_v7  ;;  %48 = vst [vmem:[#allocation5 + $0x18] sm:$0x3c] %v40_v8 }
  0x1a   :  { %p105_p12 = pnand %p104_p11, %p98_p8 }
  0x1c   :  { %108 = shalt.err (!%p105_p12)
}
  0x1d   :  { %s109_s24 = scalar_lea.hbm %s165_s1, 512 }
  0x1e   :  { %p110_p13 = scmp.ne.s32.totalorder %s165_s1, %s109_s24  ;;  %p113_p0 = scmp.lt.u32.totalorder %s109_s24, %s165_s1 }
  0x20   :  { %p115_p1 = pnand %p113_p0, %p110_p13 }
  0x22   :  { %118 = shalt.err (!%p115_p1)
}
  0x23   :  { %s128_s29 = smov 256   ;;  %s129_s30 = smov 16  }
  0x24   :  { %60 = dma.vmem_to_hbm [thread:$0]  %s55_s21, 512, %s165_s1, [#allocation4], %s128_s29, %s128_s29, %s129_s30  }
  0x25   :  { %121 = dma.done.wait [#allocation4], 512  }
  0x26   :  { %122 = vsyncadd [#allocation4], 4294966784 }
  0x27   :  { %64 = vsyncpa [#allocation3], 1 }
  0x28   :  { %65 = vsyncpa [#allocation4], 1 }

</bundles_post_ra>
